<compile_context>
chip_gen: v5e
topology: v5e:2x2
jax: 0.10.0
libtpu: 0.0.40
codegen_flags: <defaults>
</compile_context>

<pallas_src>
import functools

import numpy as np

import jax
import jax.numpy as jnp
from jax.experimental import pallas as pl
from jax.experimental.pallas import tpu as pltpu


_EPS = 1e-5
_FUSED_NEED_BUDGET = 40 * 1024 * 1024     # fused (full-M resident) VMEM budget
_VMEM_LIMIT_CAP = 48 * 1024 * 1024        # <= v7x 64 MiB physical per TC
_TM_TWO_PASS = 256                        # M tile of the two-pass fallback


# ----------------------------------------------------------------------------
# Helpers
# ----------------------------------------------------------------------------

def _round_up(x, m):
    return ((x + m - 1) // m) * m


def _choose_tn(n):
    """Lane-dense output tiles.  256-wide when N >= 512 (v6e/v7x MXU width,
    still >= 2 parallel tiles), 128-wide for N in {128, 256} (keeps >= 2 tiles
    at N = 256 for the v7x second core), else the full (small) N."""
    if n % 256 == 0 and n >= 512:
        return 256
    if n % 128 == 0:
        return 128
    return n


def _vmem_limit(need_bytes):
    return int(min(_VMEM_LIMIT_CAP, need_bytes + 16 * 1024 * 1024))


# ----------------------------------------------------------------------------
# Pallas kernels
# ----------------------------------------------------------------------------

def _conv_bn_act_kernel(*refs, n_src, relu, inv_m, eps):
    """Fused conv(-as-matmul) + BatchNorm(+ReLU), single K step, full M
    resident.  refs = a_0, b_0, ..., a_{n_src-1}, b_{n_src-1}, gamma, beta, out.
    Multiple (a, b) pairs implement a conv over channel-concatenated inputs
    without materializing the concat (decoder skip connections)."""
    o_ref = refs[-1]
    gamma_ref = refs[2 * n_src]
    beta_ref = refs[2 * n_src + 1]

    acc = jnp.dot(refs[0][...], refs[1][...],
                  preferred_element_type=jnp.float32)
    for s in range(1, n_src):
        acc = acc + jnp.dot(refs[2 * s][...], refs[2 * s + 1][...],
                            preferred_element_type=jnp.float32)

    # Zero-padded M rows contribute 0 to both sums, so dividing by the true M
    # gives exact batch statistics (PyTorch train(), biased variance).
    s1 = jnp.sum(acc, axis=0, keepdims=True)
    s2 = jnp.sum(acc * acc, axis=0, keepdims=True)
    mean = s1 * inv_m
    var = s2 * inv_m - mean * mean
    y = (acc - mean) * jax.lax.rsqrt(var + eps) * gamma_ref[...] + beta_ref[...]
    if relu:
        y = jnp.maximum(y, 0.0)
    o_ref[...] = y.astype(o_ref.dtype)


def _conv_stats_kernel(a_ref, b_ref, o_ref, s1_ref, s2_ref):
    """Two-pass fallback, pass 1: tiled matmul writing the bf16 conv output and
    accumulating per-channel sum / sum-of-squares (fp32) across the M tiles.
    Grid = (n_tiles, m_tiles); the stats outputs stay resident across m."""
    acc = jnp.dot(a_ref[...], b_ref[...], preferred_element_type=jnp.float32)

    @pl.when(pl.program_id(1) == 0)
    def _():
        s1_ref[...] = jnp.zeros_like(s1_ref)
        s2_ref[...] = jnp.zeros_like(s2_ref)

    s1_ref[...] += jnp.sum(acc, axis=0, keepdims=True)
    s2_ref[...] += jnp.sum(acc * acc, axis=0, keepdims=True)
    o_ref[...] = acc.astype(o_ref.dtype)


def _scale_shift_kernel(x_ref, sc_ref, sh_ref, o_ref, *, relu):
    """Two-pass fallback, pass 2: y = x * scale_c + shift_c (+ReLU)."""
    y = x_ref[...].astype(jnp.float32) * sc_ref[...] + sh_ref[...]
    if relu:
        y = jnp.maximum(y, 0.0)
    o_ref[...] = y.astype(o_ref.dtype)


def _bn_act_kernel(x_ref, gamma_ref, beta_ref, o_ref, *, inv_m, eps, relu):
    """Standalone BatchNorm (+ optional ReLU), tiled over channel blocks
    (UpConv.bn1)."""
    x = x_ref[...].astype(jnp.float32)
    s1 = jnp.sum(x, axis=0, keepdims=True)
    s2 = jnp.sum(x * x, axis=0, keepdims=True)
    mean = s1 * inv_m
    var = s2 * inv_m - mean * mean
    y = (x - mean) * jax.lax.rsqrt(var + eps) * gamma_ref[...] + beta_ref[...]
    if relu:
        y = jnp.maximum(y, 0.0)
    o_ref[...] = y.astype(o_ref.dtype)


# ----------------------------------------------------------------------------
# Pallas wrappers
# ----------------------------------------------------------------------------

def _matmul_two_pass_bn(a, b, gamma, beta, *, relu):
    """M-tiled conv + two-pass BN for activations too large to keep the full M
    axis resident in VMEM (or to shard M across v7x cores)."""
    M, K = a.shape
    N = b.shape[1]
    tn = _choose_tn(N)
    tm = _TM_TWO_PASS
    Mp = _round_up(M, tm)
    if Mp != M:
        a = jnp.pad(a, ((0, Mp - M), (0, 0)))

    need = 2 * (tm * K * 2 + K * tn * 2 + tm * tn * 2 + 4 * tn * 4)
    # TODO(synk): add K tiling if a single (K, tn) weight block ever exceeds
    # the VMEM budget (never the case for this network).
    assert need <= _VMEM_LIMIT_CAP, "two-pass path needs K tiling for this K"

    conv, s1, s2 = pl.pallas_call(
        _conv_stats_kernel,
        out_shape=(jax.ShapeDtypeStruct((Mp, N), jnp.bfloat16),
                   jax.ShapeDtypeStruct((1, N), jnp.float32),
                   jax.ShapeDtypeStruct((1, N), jnp.float32)),
        grid=(N // tn, Mp // tm),
        in_specs=[pl.BlockSpec((tm, K), lambda n, m: (m, 0)),
                  pl.BlockSpec((K, tn), lambda n, m: (0, n))],
        out_specs=(pl.BlockSpec((tm, tn), lambda n, m: (m, n)),
                   pl.BlockSpec((1, tn), lambda n, m: (0, n)),
                   pl.BlockSpec((1, tn), lambda n, m: (0, n))),
        compiler_params=pltpu.CompilerParams(
            dimension_semantics=("parallel", "arbitrary"),
            vmem_limit_bytes=_vmem_limit(need)),
    )(a.astype(jnp.bfloat16), b.astype(jnp.bfloat16))

    # Combine the partial statistics (tiny, per-channel) and normalize.
    mean = s1 / M
    var = s2 / M - mean * mean
    scale = gamma * jax.lax.rsqrt(var + _EPS)
    shift = beta - mean * scale

    out = pl.pallas_call(
        functools.partial(_scale_shift_kernel, relu=relu),
        out_shape=jax.ShapeDtypeStruct((Mp, N), jnp.bfloat16),
        grid=(Mp // tm, N // tn),
        in_specs=[pl.BlockSpec((tm, tn), lambda m, n: (m, n)),
                  pl.BlockSpec((1, tn), lambda m, n: (0, n)),
                  pl.BlockSpec((1, tn), lambda m, n: (0, n))],
        out_specs=pl.BlockSpec((tm, tn), lambda m, n: (m, n)),
        compiler_params=pltpu.CompilerParams(
            dimension_semantics=("parallel", "parallel")),
    )(conv, scale.astype(jnp.float32), shift.astype(jnp.float32))

    return out[:M] if Mp != M else out


def matmul_fused_bn(a_list, b_list, gamma, beta, *, relu, force_two_pass=False):
    """Conv-as-matmul fused with BatchNorm(+ReLU).

    a_list: list of (M, K_s) bf16 patch matrices; b_list: matching (K_s, N)
    bf16 weights; gamma/beta: (1, N) fp32.  Multiple list entries realize a
    conv over channel-concatenated inputs without materializing the concat.
    Returns (M, N) bf16.
    """
    assert len(a_list) == len(b_list) and len(a_list) >= 1
    M = a_list[0].shape[0]
    N = b_list[0].shape[1]
    for a, b in zip(a_list, b_list):
        assert a.shape[0] == M and b.shape[1] == N and a.shape[1] == b.shape[0]

    Mp = _round_up(M, 16)              # bf16 packs 16 rows per sublane group
    tn = _choose_tn(N)
    assert N % tn == 0

    # Conservative VMEM need (count everything double-buffered).
    a_bytes = sum(Mp * a.shape[1] * 2 for a in a_list)
    b_bytes = sum(b.shape[0] * tn * 2 for b in b_list)
    o_bytes = Mp * tn * 2
    need = 2 * (a_bytes + b_bytes + o_bytes + 2 * tn * 4)

    if force_two_pass or need > _FUSED_NEED_BUDGET:
        # Full-M residency does not fit (or M-parallelism requested): fall back
        # to the M-tiled two-pass path on the (XLA-)concatenated operands.
        if len(a_list) > 1:
            a = jnp.concatenate(a_list, axis=1)
            b = jnp.concatenate(b_list, axis=0)
        else:
            a, b = a_list[0], b_list[0]
        return _matmul_two_pass_bn(a, b, gamma, beta, relu=relu)

    if Mp != M:
        a_list = [jnp.pad(a, ((0, Mp - M), (0, 0))) for a in a_list]

    in_specs = []
    args = []
    for a, b in zip(a_list, b_list):
        ks = a.shape[1]
        # Full-K single step; the A block index is constant across the grid,
        # so the patch matrix is DMA'd into VMEM only once.
        in_specs.append(pl.BlockSpec((Mp, ks), lambda n: (0, 0)))
        in_specs.append(pl.BlockSpec((ks, tn), lambda n: (0, n)))
        args.append(a.astype(jnp.bfloat16))
        args.append(b.astype(jnp.bfloat16))
    in_specs.append(pl.BlockSpec((1, tn), lambda n: (0, n)))
    in_specs.append(pl.BlockSpec((1, tn), lambda n: (0, n)))
    args.append(gamma.astype(jnp.float32))
    args.append(beta.astype(jnp.float32))

    out = pl.pallas_call(
        functools.partial(_conv_bn_act_kernel, n_src=len(a_list), relu=relu,
                          inv_m=1.0 / M, eps=_EPS),
        out_shape=jax.ShapeDtypeStruct((Mp, N), jnp.bfloat16),
        grid=(N // tn,),
        in_specs=in_specs,
        out_specs=pl.BlockSpec((Mp, tn), lambda n: (0, n)),
        compiler_params=pltpu.CompilerParams(
            dimension_semantics=("parallel",),
            vmem_limit_bytes=_vmem_limit(need)),
    )(*args)

    return out[:M] if Mp != M else out


def batchnorm_act(x_nhwc, gamma, beta, *, relu):
    """BatchNorm2d (+ optional ReLU), tiled over channel blocks (UpConv.bn1).
    TODO(synk): fuse the preceding bilinear upsample into this kernel."""
    Nb, H, W, C = x_nhwc.shape
    M = Nb * H * W
    Mp = _round_up(M, 16)
    x2 = x_nhwc.reshape(M, C)
    if Mp != M:
        x2 = jnp.pad(x2, ((0, Mp - M), (0, 0)))
    tc = _choose_tn(C)

    out = pl.pallas_call(
        functools.partial(_bn_act_kernel, inv_m=1.0 / M, eps=_EPS, relu=relu),
        out_shape=jax.ShapeDtypeStruct((Mp, C), jnp.bfloat16),
        grid=(C // tc,),
        in_specs=[pl.BlockSpec((Mp, tc), lambda c: (0, c)),
                  pl.BlockSpec((1, tc), lambda c: (0, c)),
                  pl.BlockSpec((1, tc), lambda c: (0, c))],
        out_specs=pl.BlockSpec((Mp, tc), lambda c: (0, c)),
        compiler_params=pltpu.CompilerParams(
            dimension_semantics=("parallel",)),
    )(x2, gamma.astype(jnp.float32), beta.astype(jnp.float32))

    if Mp != M:
        out = out[:M]
    return out.reshape(Nb, H, W, C)


# ----------------------------------------------------------------------------
# Conv / pooling / upsampling glue (XLA-level plumbing around the kernels)
# ----------------------------------------------------------------------------

def _im2col(x, k):
    """x: NHWC bf16 -> (N*H*W, k*k*C), column order (dh, dw, c).
    padding='same' (trailing pad for the even 2x2 kernel, as in PyTorch).
    TODO(synk): fold the tap construction into the matmul kernel to avoid the
    (M, k*k*C) HBM intermediate."""
    N, H, W, C = x.shape
    if k == 1:
        return x.reshape(N * H * W, C)
    if k == 3:
        ph, pw = (1, 1), (1, 1)
    elif k == 2:
        ph, pw = (0, 1), (0, 1)
    else:
        raise ValueError(k)
    xp = jnp.pad(x, ((0, 0), ph, pw, (0, 0)))
    cols = [xp[:, dh:dh + H, dw:dw + W, :]
            for dh in range(k) for dw in range(k)]
    return jnp.concatenate(cols, axis=-1).reshape(N * H * W, k * k * C)


def conv_bn_act(x_list, w_list, gamma, beta, *, k, relu):
    """Conv2d (padding='same', no bias -- cancelled by BN) fused with
    BatchNorm(+ReLU).  Multiple (x, w) pairs = conv over the channel concat of
    the inputs without materializing the concat."""
    Nb, H, W, _ = x_list[0].shape
    Cout = w_list[0].shape[1]
    patches = [_im2col(x, k) for x in x_list]
    out = matmul_fused_bn(patches, w_list, gamma, beta, relu=relu)
    return out.reshape(Nb, H, W, Cout)


def conv1x1_bias(x, w2d, bias):
    """Final 1x1 conv (64 -> 4 classes) with bias.  Done as a plain XLA dot:
    a 4-lane Pallas output tile would be pure masked-store/launch overhead."""
    Nb, H, W, Cin = x.shape
    y = jnp.dot(x.reshape(-1, Cin).astype(jnp.float32),
                w2d.astype(jnp.float32)) + bias
    return y.reshape(Nb, H, W, -1)


def maxpool2x2(x):
    N, H, W, C = x.shape
    return x.reshape(N, H // 2, 2, W // 2, 2, C).max(axis=(2, 4))


def _interp_matrix(n_in, n_out):
    """Dense (n_out, n_in) bilinear interpolation matrix, align_corners=True."""
    if n_in == 1:
        return np.ones((n_out, 1), np.float32)
    src = np.arange(n_out, dtype=np.float64) * (n_in - 1) / (n_out - 1)
    i0 = np.clip(np.floor(src).astype(np.int64), 0, n_in - 2)
    w = (src - i0).astype(np.float32)
    m = np.zeros((n_out, n_in), np.float32)
    m[np.arange(n_out), i0] += 1.0 - w
    m[np.arange(n_out), i0 + 1] += w
    return m


def upsample_bilinear_x2_align_corners(x):
    """nn.Upsample(scale_factor=2, mode='bilinear', align_corners=True),
    gather-free and fully bf16 (no fp32 materialization)."""
    N, H, W, C = x.shape
    mh = jnp.asarray(_interp_matrix(H, 2 * H)).astype(jnp.bfloat16)
    mw = jnp.asarray(_interp_matrix(W, 2 * W)).astype(jnp.bfloat16)
    y = jnp.einsum('oh,nhwc->nowc', mh, x.astype(jnp.bfloat16))
    y = jnp.einsum('pw,nowc->nopc', mw, y)
    return y.astype(jnp.bfloat16)


# ----------------------------------------------------------------------------
# UNet blocks
# ----------------------------------------------------------------------------

def two_conv_block(x_list, p):
    x = conv_bn_act(x_list, p["w1"], p["g1"], p["be1"], k=3, relu=True)
    x = conv_bn_act([x], [p["w2"]], p["g2"], p["be2"], k=3, relu=True)
    return x


def up_conv(x, p):
    # UpConv in the reference has no ReLU: up -> bn1 -> conv -> bn2.
    x = upsample_bilinear_x2_align_corners(x)
    x = batchnorm_act(x, p["g1"], p["be1"], relu=False)
    x = conv_bn_act([x], [p["w"]], p["g2"], p["be2"], k=2, relu=False)
    return x


def unet_forward(x_nchw, params):
    x = jnp.transpose(x_nchw, (0, 2, 3, 1)).astype(jnp.bfloat16)   # NCHW->NHWC

    x = two_conv_block([x], params["TCB1"]); x1 = x
    x = two_conv_block([maxpool2x2(x)], params["TCB2"]); x2 = x
    x = two_conv_block([maxpool2x2(x)], params["TCB3"]); x3 = x
    x = two_conv_block([maxpool2x2(x)], params["TCB4"]); x4 = x
    x = two_conv_block([maxpool2x2(x)], params["TCB5"])

    # Decoder: torch.cat([skip, x], dim=1) is fused into the first conv of
    # each TwoConvBlock as a second (patches, weight-half) operand pair.
    x = up_conv(x, params["UC1"])
    x = two_conv_block([x4, x], params["TCB6"])
    x = up_conv(x, params["UC2"])
    x = two_conv_block([x3, x], params["TCB7"])
    x = up_conv(x, params["UC3"])
    x = two_conv_block([x2, x], params["TCB8"])
    x = up_conv(x, params["UC4"])
    x = two_conv_block([x1, x], params["TCB9"])

    x = conv1x1_bias(x, params["conv1_w"], params["conv1_b"])   # -> 4 classes
    return jnp.transpose(x, (0, 3, 1, 2))                       # NHWC -> NCHW


# ----------------------------------------------------------------------------
# Deterministic parameter init (pre-reshaped / pre-cast once; shapes follow
# the PyTorch __init__).  Conv biases before BatchNorm are omitted because
# they are exactly cancelled by the BN batch-mean subtraction.
# ----------------------------------------------------------------------------

def init_params(key):
    keys = iter(jax.random.split(key, 64))

    def conv_w(cin, cout, k):
        w = 0.05 * jax.random.normal(next(keys), (k * k * cin, cout),
                                     jnp.float32)
        return w.astype(jnp.bfloat16)               # pre-reshaped, pre-cast

    def bn_p(c):
        return (jnp.ones((1, c), jnp.float32), jnp.zeros((1, c), jnp.float32))

    def tcb_p(cins, cmid, cout):
        # cins: tuple of input-channel groups (two groups after a skip concat;
        # the concat itself is never materialized).
        g1, be1 = bn_p(cmid)
        g2, be2 = bn_p(cout)
        return dict(w1=[conv_w(c, cmid, 3) for c in cins], g1=g1, be1=be1,
                    w2=conv_w(cmid, cout, 3), g2=g2, be2=be2)

    def uc_p(cin, cout):
        g1, be1 = bn_p(cin)
        g2, be2 = bn_p(cout)
        return dict(g1=g1, be1=be1, w=conv_w(cin, cout, 2), g2=g2, be2=be2)

    params = dict(
        TCB1=tcb_p((3,), 64, 64),        TCB2=tcb_p((64,), 128, 128),
        TCB3=tcb_p((128,), 256, 256),    TCB4=tcb_p((256,), 512, 512),
        TCB5=tcb_p((512,), 1024, 1024),
        TCB6=tcb_p((512, 512), 512, 512),
        TCB7=tcb_p((256, 256), 256, 256),
        TCB8=tcb_p((128, 128), 128, 128),
        TCB9=tcb_p((64, 64), 64, 64),
        UC1=uc_p(1024, 512), UC2=uc_p(512, 256),
        UC3=uc_p(256, 128),  UC4=uc_p(128, 64),
        conv1_w=conv_w(64, 4, 1),
        conv1_b=0.05 * jax.random.normal(next(keys), (1, 4), jnp.float32),
    )
    return params


# ----------------------------------------------------------------------------
# Pure-JAX reference for the fused matmul+BN (self-check only)
# ----------------------------------------------------------------------------

def _bn_reference(a, b, gamma, beta, relu):
    conv = jnp.dot(a.astype(jnp.float32), b.astype(jnp.float32))
    mean = jnp.mean(conv, axis=0, keepdims=True)
    var = jnp.mean(conv * conv, axis=0, keepdims=True) - mean * mean
    y = (conv - mean) * jax.lax.rsqrt(var + _EPS) * gamma + beta
    if relu:
        y = jnp.maximum(y, 0.0)
    return y


# ----------------------------------------------------------------------------
# Main
# ----------------------------------------------------------------------------

if __name__ == "__main__":
    key = jax.random.PRNGKey(0)
    k_param, k_x, k_a, k_b, k_g, k_bt = jax.random.split(key, 6)

    # ---- small self-checks: fused path, dual-source path, two-pass fallback
    M, K, N = 100, 192, 256
    a = jax.random.normal(k_a, (M, K), jnp.float32).astype(jnp.bfloat16)
    b = (0.05 * jax.random.normal(k_b, (K, N), jnp.float32)).astype(jnp.bfloat16)
    gamma = 1.0 + 0.1 * jax.random.normal(k_g, (1, N), jnp.float32)
    beta = 0.1 * jax.random.normal(k_bt, (1, N), jnp.float32)

    ref = _bn_reference(a, b, gamma, beta, relu=True)
    fused = matmul_fused_bn([a], [b], gamma, beta, relu=True)
    split = matmul_fused_bn([a[:, :96], a[:, 96:]], [b[:96], b[96:]],
                            gamma, beta, relu=True)
    twop = matmul_fused_bn([a], [b], gamma, beta, relu=True,
                           force_two_pass=True)
    for got in (fused, split, twop):
        err = float(jnp.max(jnp.abs(got.astype(jnp.float32) - ref)))
        assert err < 0.1, err

    # ---- full UNet forward (NCHW, 3 channels, 16x16 so all 4 pool/upsample
    # stages are exercised)
    params = init_params(k_param)
    x = jax.random.normal(k_x, (2, 3, 16, 16), jnp.float32)

    fwd = jax.jit(unet_forward)
    out = jax.block_until_ready(fwd(x, params))

    assert out.shape == (2, 4, 16, 16), out.shape
    assert bool(jnp.all(jnp.isfinite(out)))
    print("KERNEL_OK")
</pallas_src>

<mosaic_0001>
module attributes {stable_mosaic.version = 11 : i64} {
  func.func @_conv_bn_act_kernel(%arg0: i32, %arg1: memref<112x192xbf16, #tpu.memory_space<vmem>>, %arg2: memref<192x128xbf16, #tpu.memory_space<vmem>>, %arg3: memref<1x128xf32, #tpu.memory_space<vmem>>, %arg4: memref<1x128xf32, #tpu.memory_space<vmem>>, %arg5: memref<112x128xbf16, #tpu.memory_space<vmem>>) attributes {dimension_semantics = [#tpu.dimension_semantics<parallel>], iteration_bounds = array<i64: 2>, scalar_prefetch = 0 : i64, scratch_operands = 0 : i64, tpu.core_type = #tpu.core_type<tc>, window_params = [{pipeline_mode = #tpu.pipeline_mode<synchronous>, transform_indices = @transform_0, window_bounds = array<i64: 112, 192>}, {transform_indices = @transform_1, window_bounds = array<i64: 192, 128>}, {transform_indices = @transform_2, window_bounds = array<i64: 1, 128>}, {transform_indices = @transform_3, window_bounds = array<i64: 1, 128>}, {transform_indices = @transform_4, window_bounds = array<i64: 112, 128>}]} {
    %c0 = arith.constant 0 : index
    %c0_0 = arith.constant 0 : index
    %0 = vector.load %arg1[%c0, %c0_0] : memref<112x192xbf16, #tpu.memory_space<vmem>>, vector<112x192xbf16>
    %c0_1 = arith.constant 0 : index
    %c0_2 = arith.constant 0 : index
    %1 = vector.load %arg2[%c0_1, %c0_2] : memref<192x128xbf16, #tpu.memory_space<vmem>>, vector<192x128xbf16>
    %cst = arith.constant dense<0.000000e+00> : vector<112x128xf32>
    %2 = tpu.matmul %0, %1, %cst {dimension_numbers = #tpu.dot_dimension_numbers<[1], [0], [0], [1], [0, 0, 1, 1], [], []>} : vector<112x192xbf16>, vector<192x128xbf16>, vector<112x128xf32> -> vector<112x128xf32>
    %cst_3 = arith.constant dense<0.000000e+00> : vector<128xf32>
    %3 = vector.multi_reduction <add>, %2, %cst_3 [0] : vector<112x128xf32> to vector<128xf32>
    %4 = vector.shape_cast %3 : vector<128xf32> to vector<1x128xf32>
    %5 = arith.mulf %2, %2 : vector<112x128xf32>
    %cst_4 = arith.constant dense<0.000000e+00> : vector<128xf32>
    %6 = vector.multi_reduction <add>, %5, %cst_4 [0] : vector<112x128xf32> to vector<128xf32>
    %7 = vector.shape_cast %6 : vector<128xf32> to vector<1x128xf32>
    %cst_5 = arith.constant 0.00999999977 : f32
    %8 = vector.broadcast %cst_5 : f32 to vector<1x128xf32>
    %9 = arith.mulf %4, %8 : vector<1x128xf32>
    %cst_6 = arith.constant 0.00999999977 : f32
    %10 = vector.broadcast %cst_6 : f32 to vector<1x128xf32>
    %11 = arith.mulf %7, %10 : vector<1x128xf32>
    %12 = arith.mulf %9, %9 : vector<1x128xf32>
    %13 = arith.subf %11, %12 : vector<1x128xf32>
    %14 = vector.broadcast %9 : vector<1x128xf32> to vector<112x128xf32>
    %15 = arith.subf %2, %14 : vector<112x128xf32>
    %cst_7 = arith.constant 9.99999974E-6 : f32
    %16 = vector.broadcast %cst_7 : f32 to vector<1x128xf32>
    %17 = arith.addf %13, %16 : vector<1x128xf32>
    %18 = math.rsqrt %17 : vector<1x128xf32>
    %19 = vector.broadcast %18 : vector<1x128xf32> to vector<112x128xf32>
    %20 = arith.mulf %15, %19 : vector<112x128xf32>
    %c0_8 = arith.constant 0 : index
    %c0_9 = arith.constant 0 : index
    %21 = vector.load %arg3[%c0_8, %c0_9] : memref<1x128xf32, #tpu.memory_space<vmem>>, vector<1x128xf32>
    %22 = vector.broadcast %21 : vector<1x128xf32> to vector<112x128xf32>
    %23 = arith.mulf %20, %22 : vector<112x128xf32>
    %c0_10 = arith.constant 0 : index
    %c0_11 = arith.constant 0 : index
    %24 = vector.load %arg4[%c0_10, %c0_11] : memref<1x128xf32, #tpu.memory_space<vmem>>, vector<1x128xf32>
    %25 = vector.broadcast %24 : vector<1x128xf32> to vector<112x128xf32>
    %26 = arith.addf %23, %25 : vector<112x128xf32>
    %cst_12 = arith.constant 0.000000e+00 : f32
    %27 = vector.broadcast %cst_12 : f32 to vector<112x128xf32>
    %28 = arith.maximumf %26, %27 : vector<112x128xf32>
    %29 = arith.truncf %28 : vector<112x128xf32> to vector<112x128xbf16>
    %c0_13 = arith.constant 0 : index
    %c0_14 = arith.constant 0 : index
    %30 = vector.load %arg5[%c0_13, %c0_14] : memref<112x128xbf16, #tpu.memory_space<vmem>>, vector<112x128xbf16>
    tpu.vector_store %arg5[%c0_13, %c0_14], %29 {strides = array<i32>} : memref<112x128xbf16, #tpu.memory_space<vmem>>, vector<112x128xbf16>,
    return
  }
  func.func @transform_0(%arg0: i32) -> (i32, i32) {
    %c0_i32 = arith.constant 0 : i32
    %c0_i32_0 = arith.constant 0 : i32
    %c0_i32_1 = arith.constant 0 : i32
    return %c0_i32, %c0_i32_0 : i32, i32
  }
  func.func @transform_1(%arg0: i32) -> (i32, i32) {
    %c0_i32 = arith.constant 0 : i32
    %c0_i32_0 = arith.constant 0 : i32
    return %c0_i32, %arg0 : i32, i32
  }
  func.func @transform_2(%arg0: i32) -> (i32, i32) {
    %c0_i32 = arith.constant 0 : i32
    %c0_i32_0 = arith.constant 0 : i32
    return %c0_i32, %arg0 : i32, i32
  }
  func.func @transform_3(%arg0: i32) -> (i32, i32) {
    %c0_i32 = arith.constant 0 : i32
    %c0_i32_0 = arith.constant 0 : i32
    return %c0_i32, %arg0 : i32, i32
  }
  func.func @transform_4(%arg0: i32) -> (i32, i32) {
    %c0_i32 = arith.constant 0 : i32
    %c0_i32_0 = arith.constant 0 : i32
    return %c0_i32, %arg0 : i32, i32
  }
}

</mosaic_0001>

<bundles_post_ra>
// kernel: tpu_custom_call.1
= control target key start
LH: loop header
LB: loop body
LE: loop exit
PB: predicated region body
PF: predicated region fallthrough
CT: control target
= control target key end

     0   :  { %9 = vsyncpa [#allocation4], 0  ;;  %s1614_s0 = inlined_call_operand.vmem [shape: bf16[112,192], index: 0, kind: input, shape index: {}]   ;;  %s1615_s1 = inlined_call_operand.vmem [shape: bf16[192,256], index: 1, kind: input, shape index: {}]   ;;  %s1616_s2 = inlined_call_operand.vmem [shape: f32[1,256], index: 2, kind: input, shape index: {}]   ;;  %s1617_s3 = inlined_call_operand.vmem [shape: f32[1,256], index: 3, kind: input, shape index: {}]   ;;  %s1618_s4 = inlined_call_operand.hbm [shape: bf16[112,256], index: 4, kind: output, shape index: {}]  }
   0x1   :  { %11 = vsyncpa [#allocation4 + $0x1], 0  ;;  %s1256_s15 = smov 0   ;;  %s1258_s16 = smov 0  }
   0x2   :  { %s1260_s17 = smov 0   ;;  %s1262_s18 = smov 0  }
   0x3 LB: > { %s1277_s19 = sadd.s32 4294967295, %s1226_s18   ;;  %s917_s20 = sadd.s32 4294967294, %s1226_s18   ;;  %s1226_s18 = sphi %s1262_s18, %s1624_s18   ;;  %s1222_s17 = sphi %s1260_s17, %s1623_s17   ;;  %s1218_s16 = sphi %s1258_s16, %s1622_s16   ;;  %s1214_s15 = sphi %s1256_s15, %s1621_s15  }
   0x4   : > { %s1281_s21 = sadd.s32 1, %s1226_s18   ;;  %s45_s22 = sadd.s32 1, %s1222_s17 }
   0x5   : > { %s42_s23 = ssub.s32 %s1226_s18, %s1281_s21  ;;  %p52_p0 = scmp.ne.s32.totalorder %s1222_s17, %s1218_s16 }
   0x6   : > { %p43_p1 = scmp.eq.s32.totalorder %s42_s23, 0  ;;  %p53_p2 = scmp.eq.s32.totalorder %s1226_s18, 0 }
   0x7   : > { %p134_p3 = scmp.eq.s32.totalorder %s1277_s19, 1  ;;  %p139_p4 = scmp.ne.s32.totalorder %s1218_s16, %s1214_s15 }
   0x8   : > { %s1293_s24 = scalar_select %p43_p1, %s1222_s17, %s45_s22  }
   0x9   : > { %p54_p5 = por %p53_p2, %p52_p0  ;;  %p1295_p6 = por %p134_p3, %p52_p0 }
   0xa   : > { %p140_p7 = scmp.eq.s32.totalorder %s917_s20, 1  ;;  %p919_p9 = scmp.ge.s32.totalorder %s1226_s18, 2 }
   0xc   : > { %p1299_p8 = por %p140_p7, %p139_p4  ;;  %159 = sbr.rel (%p919_p9) target bundleno = 46 (0x2e), region = 20 }
  0x11   : > { %162 = sbr.rel (!%p54_p5) target bundleno = 46 (0x2e), region = 24  ;;  %s164_s27 = sand.u32 (%p54_p5), 1, %s1222_s17  }
  0x12   : > { %s920_s28 = sshll.u32 (%p54_p5), %s1226_s18, 2  ;;  %s1115_s29 = smul.u32 (%p54_p5), 96, %s164_s27 }
  0x13   : > { %s1311_s6 = scalar_lea.vmem (%p54_p5), %s1615_s1, %s920_s28 }
  0x14   : > { %v185_v0 = vld [vmem:[%s1311_s6] sm:$0xf] (%p54_p5)  ;;  %v187_v1 = vld [vmem:[%s1311_s6 + $0x8] sm:$0xf] (%p54_p5)  ;;  %v189_v2 = vld [vmem:[%s1311_s6 + $0x10] sm:$0xf] (%p54_p5) }
  0x15   : > { %s1316_s7 = scalar_lea.vmem (%p54_p5), [#allocation2], %s1115_s29  ;;  %v191_v3 = vld [vmem:[%s1311_s6 + $0x18] sm:$0xf] (%p54_p5)  ;;  %v193_v4 = vld [vmem:[%s1311_s6 + $0x20] sm:$0xf] (%p54_p5) }
  0x16   : > { %186 = vst [vmem:[%s1316_s7] sm:$0xf] %v185_v0  ;;  %v195_v5 = vld [vmem:[%s1311_s6 + $0x28] sm:$0xf]  ;;  %v197_v6 = vld [vmem:[%s1311_s6 + $0x30] sm:$0xf] }
  0x17   : > { %188 = vst [vmem:[%s1316_s7 + $0x4] sm:$0xf] %v187_v1  ;;  %v199_v7 = vld [vmem:[%s1311_s6 + $0x38] sm:$0xf]  ;;  %v201_v8 = vld [vmem:[%s1311_s6 + $0x40] sm:$0xf] }
  0x18   : > { %190 = vst [vmem:[%s1316_s7 + $0x8] sm:$0xf] %v189_v2  ;;  %v203_v9 = vld [vmem:[%s1311_s6 + $0x48] sm:$0xf]  ;;  %v205_v10 = vld [vmem:[%s1311_s6 + $0x50] sm:$0xf] }
  0x19   : > { %192 = vst [vmem:[%s1316_s7 + $0xc] sm:$0xf] %v191_v3  ;;  %v207_v11 = vld [vmem:[%s1311_s6 + $0x58] sm:$0xf]  ;;  %v209_v12 = vld [vmem:[%s1311_s6 + $0x60] sm:$0xf] }
  0x1a   : > { %194 = vst [vmem:[%s1316_s7 + $0x10] sm:$0xf] %v193_v4  ;;  %v211_v13 = vld [vmem:[%s1311_s6 + $0x68] sm:$0xf]  ;;  %v213_v14 = vld [vmem:[%s1311_s6 + $0x70] sm:$0xf] }
  0x1b   : > { %196 = vst [vmem:[%s1316_s7 + $0x14] sm:$0xf] %v195_v5  ;;  %v215_v15 = vld [vmem:[%s1311_s6 + $0x78] sm:$0xf]  ;;  %v217_v16 = vld [vmem:[%s1311_s6 + $0x80] sm:$0xf] }
  0x1c   : > { %198 = vst [vmem:[%s1316_s7 + $0x18] sm:$0xf] %v197_v6  ;;  %v219_v17 = vld [vmem:[%s1311_s6 + $0x88] sm:$0xf]  ;;  %v221_v18 = vld [vmem:[%s1311_s6 + $0x90] sm:$0xf] }
  0x1d   : > { %200 = vst [vmem:[%s1316_s7 + $0x1c] sm:$0xf] %v199_v7  ;;  %v223_v19 = vld [vmem:[%s1311_s6 + $0x98] sm:$0xf]  ;;  %v225_v20 = vld [vmem:[%s1311_s6 + $0xa0] sm:$0xf] }
  0x1e   : > { %202 = vst [vmem:[%s1316_s7 + $0x20] sm:$0xf] %v201_v8  ;;  %v227_v21 = vld [vmem:[%s1311_s6 + $0xa8] sm:$0xf]  ;;  %v229_v22 = vld [vmem:[%s1311_s6 + $0xb0] sm:$0xf] }
  0x1f   : > { %204 = vst [vmem:[%s1316_s7 + $0x24] sm:$0xf] %v203_v9  ;;  %v231_v23 = vld [vmem:[%s1311_s6 + $0xb8] sm:$0xf] }
  0x20   : > { %206 = vst [vmem:[%s1316_s7 + $0x28] sm:$0xf] %v205_v10 }
  0x21   : > { %208 = vst [vmem:[%s1316_s7 + $0x2c] sm:$0xf] %v207_v11 }
  0x22   : > { %210 = vst [vmem:[%s1316_s7 + $0x30] sm:$0xf] %v209_v12 }
  0x23   : > { %212 = vst [vmem:[%s1316_s7 + $0x34] sm:$0xf] %v211_v13 }
  0x24   : > { %214 = vst [vmem:[%s1316_s7 + $0x38] sm:$0xf] %v213_v14 }
  0x25   : > { %216 = vst [vmem:[%s1316_s7 + $0x3c] sm:$0xf] %v215_v15 }
  0x26   : > { %218 = vst [vmem:[%s1316_s7 + $0x40] sm:$0xf] %v217_v16 }
  0x27   : > { %220 = vst [vmem:[%s1316_s7 + $0x44] sm:$0xf] %v219_v17 }
  0x28   : > { %222 = vst [vmem:[%s1316_s7 + $0x48] sm:$0xf] %v221_v18 }
  0x29   : > { %224 = vst [vmem:[%s1316_s7 + $0x4c] sm:$0xf] %v223_v19 }
  0x2a   : > { %226 = vst [vmem:[%s1316_s7 + $0x50] sm:$0xf] %v225_v20 }
  0x2b   : > { %228 = vst [vmem:[%s1316_s7 + $0x54] sm:$0xf] %v227_v21 }
  0x2c   : > { %230 = vst [vmem:[%s1316_s7 + $0x58] sm:$0xf] %v229_v22 }
  0x2d   : > { %232 = vst [vmem:[%s1316_s7 + $0x5c] sm:$0xf] %v231_v23 }
  0x2e PF: > { %p921_p10 = scmp.ge.s32.totalorder %s1226_s18, 1  ;;  %p315_p11 = scmp.lt.s32.totalorder %s1226_s18, 3 }
  0x30   : > { %p316_p12 = pnand %p921_p10, %p315_p11 }
  0x31   : > { %s1366_s8 = sand.u32 (!%p316_p12), 1, %s1218_s16   ;;  %p353_p13 = scmp.lt.s32.totalorder (!%p316_p12), %s1277_s19, 1 }
  0x32   : > { %319 = sbr.rel (%p316_p12) target bundleno = 344 (0x158), region = 73  ;;  %s817_s30 = scalar_lea.sflag (!%p316_p12), [#allocation4], %s1366_s8 }
  0x33   : > { %s1116_s9 = smul.u32 (!%p316_p12), 96, %s1366_s8  ;;  %s1184_s11 = scalar_lea.hbm (!%p316_p12), %s1618_s4, 112 }
  0x34   : > { %s1117_s20 = smul.u32 (!%p316_p12), 56, %s1366_s8 }
  0x35   : > { %s1369_s10 = scalar_lea.vmem (!%p316_p12), [#allocation2], %s1116_s9 }
  0x36   : > { %s1572_s22 = scalar_lea.vmem (!%p316_p12), [#allocation3], %s1117_s20 }
  0x37   : > { %v1057_v24 = vld [vmem:[%s1369_s10 + $0x38] sm:$0xff]  ;;  %v1056_v26 = vld [vmem:[%s1369_s10 + $0x30] sm:$0xff]  ;;  %v1055_v28 = vld [vmem:[%s1369_s10 + $0x28] sm:$0xff]  ;;  %vm533_vm0 = vcmask 523264   ;;  %s1476_s28 = scalar_select %p353_p13, %s1277_s19, 1 }
  0x38   : > { %v1061_v25 = vld [vmem:[%s1369_s10 + $0x58] sm:$0xff]  ;;  %555 = vmatpush.bf16.msra.mxu0 %v1057_v24  ;;  %1103 = vmatpush.bf16.msra.mxu2 %v1057_v24  ;;  %v1060_v27 = vld [vmem:[%s1369_s10 + $0x50] sm:$0xff]  ;;  %v1059_v29 = vld [vmem:[%s1369_s10 + $0x48] sm:$0xff] }
  0x39   : > { %603 = vmatpush.bf16.msra.mxu1 %v1061_v25  ;;  %1111 = vmatpush.bf16.msra.mxu3 %v1061_v25  ;;  %v1054_v30 = vld [vmem:[%s1369_s10 + $0x20] sm:$0xff]  ;;  %v926_v33 = vld [vmem:[%s1614_s0 + $0x8] sm:$0xf0]  ;;  %v1053_v37 = vld [vmem:[%s1369_s10 + $0x18] sm:$0xff]  ;;  %s355_s5 = scalar_lea.vmem %s1616_s2, %s1476_s28  ;;  %s358_s9 = scalar_lea.vmem %s1617_s3, %s1476_s28 }
  0x3a   : > { %v1058_v31 = vld [vmem:[%s1369_s10 + $0x40] sm:$0xff]  ;;  %v958_v35 = vld [vmem:[%s1614_s0 + $0x48] sm:$0xf0]  ;;  %v1052_v39 = vld [vmem:[%s1369_s10 + $0x10] sm:$0xff]  ;;  %s828_s28 = sshll.u32 %s1572_s22, 4  ;;  %s829_s28 = int_to_ptr.vmem [resolvable:$true] %s828_s28 }
  0x3b   : > { %v1036_v32 = vld [vmem:[%s1614_s0 + $0x4] sm:$0xf]  ;;  %v1051_v40 = vld [vmem:[%s1369_s10 + $0x8] sm:$0xff]  ;;  %v924_v41 = vld [vmem:[%s1614_s0] sm:$0xf] }
  0x3c   : > { %556 = vmatpush.bf16.msra.mxu0 %v1056_v26  ;;  %1104 = vmatpush.bf16.msra.mxu2 %v1056_v26  ;;  %v1044_v34 = vld [vmem:[%s1614_s0 + $0x44] sm:$0xf]  ;;  %v929_v36 = vor.u32 %v1036_v32, %v926_v33  ;;  %v1037_v43 = vld [vmem:[%s1614_s0 + $0x4] sm:$0xf0]  ;;  %v948_v44 = vld [vmem:[%s1614_s0 + $0x30] sm:$0xf] }
  0x3d   : > { %604 = vmatpush.bf16.msra.mxu1 %v1060_v27  ;;  %1112 = vmatpush.bf16.msra.mxu3 %v1060_v27  ;;  %v961_v38 = vor.u32 %v1044_v34, %v958_v35  ;;  %v1050_v42 = vld [vmem:[%s1369_s10] sm:$0xff]  ;;  %v1043_v45 = vld [vmem:[%s1614_s0 + $0x34] sm:$0xf0]  ;;  %v1038_v46 = vld [vmem:[%s1614_s0 + $0x14] sm:$0xf]  ;;  %v925_v50 = vor.u32 %v1037_v43, %v924_v41  ;;  %s1033_s10 = sshll.u32 %s1277_s19, 2 }
  0x3e   : > { %v934_v47 = vld [vmem:[%s1614_s0 + $0x18] sm:$0xf0]  ;;  %v1046_v48 = vld [vmem:[%s1614_s0 + $0x54] sm:$0xf]  ;;  %v949_v51 = vor.u32 %v1043_v45, %v948_v44  ;;  %v932_v54 = vld [vmem:[%s1614_s0 + $0x10] sm:$0xf]  ;;  %s827_s27 = scalar_lea.hbm %s1618_s4, %s1033_s10 }
  0x3f   : > { %v966_v49 = vld [vmem:[%s1614_s0 + $0x58] sm:$0xf0]  ;;  %v937_v52 = vor.u32 %v1038_v46, %v934_v47  ;;  %v1039_v55 = vld [vmem:[%s1614_s0 + $0x14] sm:$0xf0]  ;;  %v956_v56 = vld [vmem:[%s1614_s0 + $0x40] sm:$0xf] }
  0x40   : > { %557 = vmatpush.bf16.msra.mxu0 %v1055_v28  ;;  %1105 = vmatpush.bf16.msra.mxu2 %v1055_v28  ;;  %v969_v53 = vor.u32 %v1046_v48, %v966_v49  ;;  %v1045_v57 = vld [vmem:[%s1614_s0 + $0x44] sm:$0xf0]  ;;  %v1040_v58 = vld [vmem:[%s1614_s0 + $0x24] sm:$0xf]  ;;  %v942_v59 = vld [vmem:[%s1614_s0 + $0x28] sm:$0xf0]  ;;  %v933_v62 = vor.u32 %v1039_v55, %v932_v54 }
  0x41   : > { %605 = vmatpush.bf16.msra.mxu1 %v1059_v29  ;;  %1113 = vmatpush.bf16.msra.mxu3 %v1059_v29  ;;  %v1048_v60 = vld [vmem:[%s1614_s0 + $0x64] sm:$0xf]  ;;  %v974_v61 = vld [vmem:[%s1614_s0 + $0x68] sm:$0xf0]  ;;  %v957_v63 = vor.u32 %v1045_v57, %v956_v56  ;;  %v945_v0 = vor.u32 %v1040_v58, %v942_v59  ;;  %v940_v2 = vld [vmem:[%s1614_s0 + $0x20] sm:$0xf] }
  0x42   : > { %v977_v1 = vor.u32 %v1048_v60, %v974_v61  ;;  %v1041_v3 = vld [vmem:[%s1614_s0 + $0x24] sm:$0xf0]  ;;  %v964_v4 = vld [vmem:[%s1614_s0 + $0x50] sm:$0xf]  ;;  %v1047_v5 = vld [vmem:[%s1614_s0 + $0x54] sm:$0xf0] }
  0x43   : > { %v1042_v6 = vld [vmem:[%s1614_s0 + $0x34] sm:$0xf]  ;;  %v950_v7 = vld [vmem:[%s1614_s0 + $0x38] sm:$0xf0]  ;;  %v941_v8 = vor.u32 %v1041_v3, %v940_v2  ;;  %v965_v9 = vor.u32 %v1047_v5, %v964_v4  ;;  %v972_v11 = vld [vmem:[%s1614_s0 + $0x60] sm:$0xf] }
  0x44   : > { %558 = vmatpush.bf16.msra.mxu0 %v1054_v30  ;;  %1106 = vmatpush.bf16.msra.mxu2 %v1054_v30  ;;  %v953_v10 = vor.u32 %v1042_v6, %v950_v7  ;;  %v1049_v12 = vld [vmem:[%s1614_s0 + $0x64] sm:$0xf0]  ;;  %s830_s29 = sshll.u32 %s827_s27, 4  ;;  %s831_s29 = int_to_ptr.hbm [resolvable:$true] %s830_s29 }
  0x45   : > { %606 = vmatpush.bf16.msra.mxu1 %v1058_v31  ;;  %1114 = vmatpush.bf16.msra.mxu3 %v1058_v31  ;;  %v973_v13 = vor.u32 %v1049_v12, %v972_v11 }
  0x48   : > { %1026 = vmatmul.msk.bf16.vlgmr.msra.gmra.mxu1 %vm533_vm0, %v929_v36  ;;  %559 = vmatpush.bf16.msra.mxu0 %v1053_v37 }
  0x49   : > { %1107 = vmatpush.bf16.msra.mxu2 %v1053_v37  ;;  %1030 = vmatmul.msk.bf16.vlgmr.msra.gmra.mxu3 %vm533_vm0, %v961_v38 }
  0x4c   : > { %560 = vmatpush.bf16.msra.mxu0 %v1052_v39 }
  0x4d   : > { %1108 = vmatpush.bf16.msra.mxu2 %v1052_v39 }
  0x50   : > { %561 = vmatpush.bf16.msra.mxu0 %v1051_v40 }
  0x51   : > { %1109 = vmatpush.bf16.msra.mxu2 %v1051_v40 }
  0x54   : > { %562 = vmatpush.bf16.msra.mxu0 %v1050_v42 }
  0x55   : > { %1110 = vmatpush.bf16.msra.mxu2 %v1050_v42 }
  0x57   : > { %563 = vmatmul.bf16.vlgmr.msra.gmra.mxu0 %v925_v50 }
  0x58   : > { %578 = vmatmul.bf16.vlgmr.msra.gmra.mxu2 %v949_v51  ;;  %1027 = vmatmul.msk.bf16.gmra.mxu1 %vm533_vm0, %v937_v52 }
  0x59   : > { %1031 = vmatmul.msk.bf16.gmra.mxu3 %vm533_vm0, %v969_v53 }
  0x67   : > { %568 = vmatmul.bf16.gmra.mxu0 %v933_v62 }
  0x68   : > { %583 = vmatmul.bf16.gmra.mxu2 %v957_v63  ;;  %1028 = vmatmul.msk.bf16.gmra.mxu1 %vm533_vm0, %v945_v0 }
  0x69   : > { %1032 = vmatmul.msk.bf16.gmra.mxu3 %vm533_vm0, %v977_v1 }
  0x77   : > { %573 = vmatmul.bf16.gmra.mxu0 %v941_v8 }
  0x78   : > { %588 = vmatmul.bf16.gmra.mxu2 %v965_v9  ;;  %1029 = vmatmul.msk.bf16.gmra.mxu1 %vm533_vm0, %v953_v10 }
  0x88   : > { %593 = vmatmul.bf16.gmra.mxu2 %v973_v13 }
  0xc5   : > { %v608_v14 = vpop.f32.mrf.mxu1 }
  0xcc   : > { %v628_v21 = vpop.f32.mrf.mxu3 }
  0xcd   : > { %v610_v15 = vpop.f32.mrf.mxu1 }
  0xd4   : > { %v564_v16 = vpop.f32.mrf.mxu0  ;;  %v630_v26 = vpop.f32.mrf.mxu3 }
  0xd5   : > { %v613_v17 = vpop.f32.mrf.mxu1  ;;  %v1488_v30 = vadd.f32 %v608_v14, %v564_v16 }
  0xd7   : > { %v662_v38 = vmul.f32 %v1488_v30, %v1488_v30 }
  0xdb   : > { %v579_v18 = vpop.f32.mrf.mxu2 }
  0xdc   : > { %v566_v19 = vpop.f32.mrf.mxu0  ;;  %v633_v36 = vpop.f32.mrf.mxu3 }
  0xdd   : > { %v615_v20 = vpop.f32.mrf.mxu1  ;;  %v1486_v29 = vadd.f32 %v610_v15, %v566_v19 }
  0xdf   : > { %v663_v34 = vmul.f32 %v1486_v29, %v1486_v29  ;;  %v643_v39 = vadd.f32 %v1486_v29, %v1488_v30 }
  0xe1   : > { %v676_v42 = vadd.f32 %v663_v34, %v662_v38 }
  0xe3   : > { %v581_v22 = vpop.f32.mrf.mxu2 }
  0xe4   : > { %v569_v23 = vpop.f32.mrf.mxu0  ;;  %v635_v56 = vpop.f32.mrf.mxu3 }
  0xe5   : > { %v618_v24 = vpop.f32.mrf.mxu1  ;;  %v1490_v31 = vadd.f32 %v613_v17, %v569_v23 }
  0xe7   : > { %v664_v40 = vmul.f32 %v1490_v31, %v1490_v31  ;;  %v644_v43 = vadd.f32 %v643_v39, %v1490_v31 }
  0xe9   : > { %v677_v45 = vadd.f32 %v676_v42, %v664_v40 }
  0xeb   : > { %v584_v25 = vpop.f32.mrf.mxu2 }
  0xec   : > { %v571_v27 = vpop.f32.mrf.mxu0  ;;  %v1520_v60 = vadd.f32 %v628_v21, %v584_v25  ;;  %v638_v12 = vpop.f32.mrf.mxu3 }
  0xed   : > { %v620_v28 = vpop.f32.mrf.mxu1  ;;  %v1494_v35 = vadd.f32 %v615_v20, %v571_v27 }
  0xee   : > { %v670_v5 = vmul.f32 %v1520_v60, %v1520_v60 }
  0xef   : > { %v665_v44 = vmul.f32 %v1494_v35, %v1494_v35  ;;  %v645_v46 = vadd.f32 %v644_v43, %v1494_v35 }
  0xf1   : > { %v678_v50 = vadd.f32 %v677_v45, %v665_v44 }
  0xf3   : > { %v586_v32 = vpop.f32.mrf.mxu2 }
  0xf4   : > { %v574_v33 = vpop.f32.mrf.mxu0  ;;  %v1528_v4 = vadd.f32 %v630_v26, %v586_v32 }
  0xf5   : > { %v623_v37 = vpop.f32.mrf.mxu1  ;;  %v1502_v41 = vadd.f32 %v618_v24, %v574_v33  ;;  %v640_v24 = vpop.f32.mrf.mxu3 }
  0xf6   : > { %v1511_v52 = vadd.f32 %v623_v37, %v579_v18  ;;  %v671_v9 = vmul.f32 %v1528_v4, %v1528_v4 }
  0xf7   : > { %v666_v47 = vmul.f32 %v1502_v41, %v1502_v41  ;;  %v646_v51 = vadd.f32 %v645_v46, %v1502_v41 }
  0xf8   : > { %v668_v61 = vmul.f32 %v1511_v52, %v1511_v52 }
  0xf9   : > { %v679_v55 = vadd.f32 %v678_v50, %v666_v47 }
  0xfb   : > { %v589_v48 = vpop.f32.mrf.mxu2 }
  0xfc   : > { %v576_v49 = vpop.f32.mrf.mxu0  ;;  %v1535_v10 = vadd.f32 %v633_v36, %v589_v48 }
  0xfd   : > { %v1513_v53 = vadd.f32 %v620_v28, %v576_v49  ;;  %v625_v54 = vpop.f32.mrf.mxu1 }
  0xfe   : > { %v1518_v59 = vadd.f32 %v625_v54, %v581_v22  ;;  %v672_v15 = vmul.f32 %v1535_v10, %v1535_v10 }
  0xff   : > { %v647_v57 = vadd.f32 %v646_v51, %v1513_v53  ;;  %v667_v58 = vmul.f32 %v1513_v53, %v1513_v53 }
 0x100   : > { %v669_v1 = vmul.f32 %v1518_v59, %v1518_v59 }
 0x101   : > { %v680_v62 = vadd.f32 %v679_v55, %v667_v58  ;;  %v648_v63 = vadd.f32 %v647_v57, %v1511_v52 }
 0x103   : > { %v649_v0 = vadd.f32 %v648_v63, %v1518_v59  ;;  %v681_v2 = vadd.f32 %v680_v62, %v668_v61  ;;  %v591_v3 = vpop.f32.mrf.mxu2 }
 0x104   : > { %v1540_v16 = vadd.f32 %v635_v56, %v591_v3 }
 0x105   : > { %v650_v6 = vadd.f32 %v649_v0, %v1520_v60  ;;  %v682_v7 = vadd.f32 %v681_v2, %v669_v1 }
 0x106   : > { %v673_v21 = vmul.f32 %v1540_v16, %v1540_v16 }
 0x107   : > { %v683_v8 = vadd.f32 %v682_v7, %v670_v5  ;;  %v651_v11 = vadd.f32 %v650_v6, %v1528_v4 }
 0x109   : > { %v684_v13 = vadd.f32 %v683_v8, %v671_v9  ;;  %v652_v17 = vadd.f32 %v651_v11, %v1535_v10  ;;  %v1160_v8 = vld [vmem:[%s355_s5] ss:$0 sm:$0xff]  ;;  %s1178_s5 = sshra.s32 %s831_s29, 4  ;;  %s1179_s5 = int_to_ptr.hbm [resolvable:$true] %s1178_s5 }
 0x10a   : > { %s1180_s6 = scalar_lea.hbm %s1179_s5, 56  ;;  %p1185_p3 = scmp.lt.s32.totalorder %s1179_s5, %s1618_s4 }
 0x10b   : > { %v594_v14 = vpop.f32.mrf.mxu2  ;;  %v685_v18 = vadd.f32 %v684_v13, %v672_v15  ;;  %v653_v20 = vadd.f32 %v652_v17, %v1540_v16  ;;  %p1181_p0 = scmp.ne.s32.totalorder %s1179_s5, %s1180_s6  ;;  %p1186_p4 = scmp.lt.s32.totalorder %s1184_s11, %s1180_s6 }
 0x10c   : > { %v639_v19 = vadd.f32 %v638_v12, %v594_v14 }
 0x10d   : > { %v686_v22 = vadd.f32 %v685_v18, %v673_v21  ;;  %p1182_p1 = pnand %p1181_p0, %p1295_p6  ;;  %p1187_p5 = por %p1186_p4, %p1185_p3 }
 0x10e   : > { %v674_v23 = vmul.f32 %v639_v19, %v639_v19  ;;  %v654_v26 = vadd.f32 %v653_v20, %v639_v19 }
 0x10f   : > { %p1183_p2 = pneg %p1182_p1 }
 0x110   : > { %v687_v28 = vadd.f32 %v686_v22, %v674_v23 }
 0x111   : > { %p1188_p7 = pnand %p1187_p5, %p1183_p2 }
 0x113   : > { %v596_v25 = vpop.f32.mrf.mxu2 }
 0x114   : > { %v641_v27 = vadd.f32 %v640_v24, %v596_v25 }
 0x116   : > { %v655_v32 = vadd.f32 %v654_v26, %v641_v27  ;;  %v675_v33 = vmul.f32 %v641_v27, %v641_v27 }
 0x118   : > { %v656_v34 = vrot.slane %v655_v32, 4  ;;  %v688_v36 = vadd.f32 %v687_v28, %v675_v33 }
 0x11a   : > { %v657_v37 = vadd.f32 %v656_v34, %v655_v32  ;;  %v689_v38 = vrot.slane %v688_v36, 4 }
 0x11c   : > { %v658_v39 = vrot.slane %v657_v37, 2  ;;  %v690_v40 = vadd.f32 %v689_v38, %v688_v36 }
 0x11e   : > { %v659_v42 = vadd.f32 %v658_v39, %v657_v37  ;;  %v691_v43 = vrot.slane %v690_v40, 2 }
 0x120   : > { %v660_v44 = vrot.slane %v659_v42, 1  ;;  %v692_v45 = vadd.f32 %v691_v43, %v690_v40 }
 0x122   : > { %v661_v46 = vadd.f32 %v660_v44, %v659_v42  ;;  %v693_v47 = vrot.slane %v692_v45, 1 }
 0x124   : > { %v694_v48 = vadd.f32 %v693_v47, %v692_v45  ;;  %v695_v49 = vmul.f32 0.01, %v661_v46 }
 0x126   : > { %v696_v50 = vmul.f32 0.01, %v694_v48  ;;  %v697_v51 = vmul.f32 %v695_v49, %v695_v49  ;;  %v711_v62 = vsub.f32 %v639_v19, %v695_v49  ;;  %v712_v0 = vsub.f32 %v641_v27, %v695_v49 }
 0x127   : > { %v699_v1 = vsub.f32 %v1488_v30, %v695_v49  ;;  %v700_v2 = vsub.f32 %v1486_v29, %v695_v49  ;;  %v701_v3 = vsub.f32 %v1490_v31, %v695_v49  ;;  %v702_v6 = vsub.f32 %v1494_v35, %v695_v49 }
 0x128   : > { %v698_v54 = vsub.f32 %v696_v50, %v697_v51  ;;  %v703_v7 = vsub.f32 %v1502_v41, %v695_v49  ;;  %v704_v9 = vsub.f32 %v1513_v53, %v695_v49  ;;  %v705_v30 = vsub.f32 %v1511_v52, %v695_v49  ;;  %v1161_v53 = vld [vmem:[%s358_s9] ss:$0 sm:$0xff] }
 0x129   : > { %v706_v29 = vsub.f32 %v1518_v59, %v695_v49  ;;  %v707_v31 = vsub.f32 %v1520_v60, %v695_v49  ;;  %v708_v12 = vsub.f32 %v1528_v4, %v695_v49  ;;  %v709_v35 = vsub.f32 %v1535_v10, %v695_v49 }
 0x12a   : > { %v713_v55 = vadd.f32 1e-05, %v698_v54  ;;  %v710_v41 = vsub.f32 %v1540_v16, %v695_v49 }
 0x12c   : > { %1162 = vrsqrt.f32 %v713_v55  ;;  %vm720_vm2 = vweird.f32 %v713_v55 }
 0x132   : > { %v1163_v56 = vpop.eup %1162 }
 0x133   : > { %v715_v57 = vmul.f32 %v1163_v56, %v713_v55  ;;  %vm721_vm1 = vweird.f32 %v1163_v56 }
 0x134   : > { %vm722_vm3 = vmor %vm720_vm2, %vm721_vm1 }
 0x135   : > { %v716_v58 = vmul.f32 %v1163_v56, %v715_v57 }
 0x137   : > { %v717_v61 = vmul.f32 0.5, %v716_v58 }
 0x139   : > { %v718_v63 = vsub.f32 1.5, %v717_v61 }
 0x13b   : > { %v719_v5 = vmul.f32 %v1163_v56, %v718_v63 }
 0x13d   : > { %v723_v11 = vsel %vm722_vm3, %v1163_v56, %v719_v5 }
 0x13e   : > { %v736_v13 = vmul.f32 %v723_v11, %v711_v62  ;;  %v737_v14 = vmul.f32 %v723_v11, %v712_v0  ;;  %v724_v52 = vmul.f32 %v723_v11, %v699_v1  ;;  %v725_v15 = vmul.f32 %v723_v11, %v700_v2 }
 0x13f   : > { %v726_v59 = vmul.f32 %v723_v11, %v701_v3  ;;  %v727_v17 = vmul.f32 %v723_v11, %v702_v6  ;;  %v728_v60 = vmul.f32 %v723_v11, %v703_v7  ;;  %v729_v18 = vmul.f32 %v723_v11, %v704_v9 }
 0x140   : > { %v754_v19 = vmul.f32 %v1160_v8, %v736_v13  ;;  %v755_v4 = vmul.f32 %v1160_v8, %v737_v14  ;;  %v730_v20 = vmul.f32 %v723_v11, %v705_v30  ;;  %v731_v21 = vmul.f32 %v723_v11, %v706_v29 }
 0x141   : > { %v732_v10 = vmul.f32 %v723_v11, %v707_v31  ;;  %v733_v16 = vmul.f32 %v723_v11, %v708_v12  ;;  %v734_v22 = vmul.f32 %v723_v11, %v709_v35  ;;  %v735_v23 = vmul.f32 %v723_v11, %v710_v41 }
 0x142   : > { %v772_v24 = vadd.f32 %v1161_v53, %v754_v19  ;;  %v773_v25 = vadd.f32 %v1161_v53, %v755_v4  ;;  %v742_v26 = vmul.f32 %v1160_v8, %v724_v52  ;;  %v743_v27 = vmul.f32 %v1160_v8, %v725_v15 }
 0x143   : > { %v744_v28 = vmul.f32 %v1160_v8, %v726_v59  ;;  %v745_v32 = vmul.f32 %v1160_v8, %v727_v17  ;;  %v746_v33 = vmul.f32 %v1160_v8, %v728_v60  ;;  %v747_v34 = vmul.f32 %v1160_v8, %v729_v18 }
 0x144   : > { %v786_v36 = vmax.f32 %v772_v24, 0.0  ;;  %v787_v37 = vmax.f32 %v773_v25, 0.0  ;;  %v748_v38 = vmul.f32 %v1160_v8, %v730_v20  ;;  %v749_v39 = vmul.f32 %v1160_v8, %v731_v21 }
 0x145   : > { %v750_v40 = vmul.f32 %v1160_v8, %v732_v10  ;;  %v751_v42 = vmul.f32 %v1160_v8, %v733_v16  ;;  %v752_v43 = vmul.f32 %v1160_v8, %v734_v22  ;;  %v753_v44 = vmul.f32 %v1160_v8, %v735_v23 }
 0x146   : > { %v1095_v45 = vpack.c.bf16 %v787_v37, %v786_v36  ;;  %v760_v46 = vadd.f32 %v1161_v53, %v742_v26  ;;  %v761_v47 = vadd.f32 %v1161_v53, %v743_v27  ;;  %v762_v48 = vadd.f32 %v1161_v53, %v744_v28 }
 0x147   : > { %v763_v49 = vadd.f32 %v1161_v53, %v745_v32  ;;  %v764_v50 = vadd.f32 %v1161_v53, %v746_v33  ;;  %v765_v51 = vadd.f32 %v1161_v53, %v747_v34  ;;  %v766_v54 = vadd.f32 %v1161_v53, %v748_v38 }
 0x148   : > { %1102 = vst [vmem:[%s1572_s22 + $0x30] sm:$0xff] %v1095_v45   ;;  %v767_v55 = vadd.f32 %v1161_v53, %v749_v39  ;;  %v768_v56 = vadd.f32 %v1161_v53, %v750_v40  ;;  %v769_v57 = vadd.f32 %v1161_v53, %v751_v42  ;;  %v770_v58 = vadd.f32 %v1161_v53, %v752_v43 }
 0x149   : > { %v771_v61 = vadd.f32 %v1161_v53, %v753_v44  ;;  %v774_v62 = vmax.f32 %v760_v46, 0.0  ;;  %v775_v63 = vmax.f32 %v761_v47, 0.0  ;;  %v776_v0 = vmax.f32 %v762_v48, 0.0 }
 0x14a   : > { %v777_v1 = vmax.f32 %v763_v49, 0.0  ;;  %v778_v2 = vmax.f32 %v764_v50, 0.0  ;;  %v779_v3 = vmax.f32 %v765_v51, 0.0  ;;  %v780_v5 = vmax.f32 %v766_v54, 0.0 }
 0x14b   : > { %v781_v6 = vmax.f32 %v767_v55, 0.0  ;;  %v782_v7 = vmax.f32 %v768_v56, 0.0  ;;  %v783_v8 = vmax.f32 %v769_v57, 0.0  ;;  %v784_v9 = vmax.f32 %v770_v58, 0.0 }
 0x14c   : > { %v785_v30 = vmax.f32 %v771_v61, 0.0  ;;  %v1065_v29 = vpack.c.bf16 %v775_v63, %v774_v62  ;;  %v1070_v31 = vpack.c.bf16 %v777_v1, %v776_v0  ;;  %v1075_v11 = vpack.c.bf16 %v779_v3, %v778_v2 }
 0x14d   : > { %v1080_v12 = vpack.c.bf16 %v781_v6, %v780_v5  ;;  %v1085_v35 = vpack.c.bf16 %v783_v8, %v782_v7 }
 0x14e   : > { %1066 = vst [vmem:[%s1572_s22] sm:$0xff] %v1065_v29   ;;  %v1090_v41 = vpack.c.bf16 %v785_v30, %v784_v9 }
 0x14f   : > { %1097 = vst [vmem:[%s1572_s22 + $0x8] sm:$0xff] %v1070_v31  }
 0x150   : > { %1098 = vst [vmem:[%s1572_s22 + $0x10] sm:$0xff] %v1075_v11  }
 0x151   : > { %1099 = vst [vmem:[%s1572_s22 + $0x18] sm:$0xff] %v1080_v12  }
 0x152   : > { %1100 = vst [vmem:[%s1572_s22 + $0x20] sm:$0xff] %v1085_v35  }
 0x153   : > { %1101 = vst [vmem:[%s1572_s22 + $0x28] sm:$0xff] %v1090_v41  }
 0x154   : > { %1191 = shalt.err (!%p1188_p7)
}
 0x155   : > { %s1228_s8 = smov 64   ;;  %s1229_s14 = smov 128  }
 0x156   : > { %s1230_s20 = smov 4  }
 0x157   : > { %1118 = dma.vmem_to_hbm [thread:$0]  (%p1295_p6), %s829_s28, 896, %s831_s29, %s817_s30, %s1228_s8, %s1229_s14, %s1230_s20  }
 0x158 PF: > { %s845_s10 = sand.u32 1, %s1214_s15   ;;  %p1121_p10 = pnand %p919_p9, %p1299_p8 }
 0x159   : > { %s846_s22 = scalar_lea.sflag [#allocation4], %s845_s10 }
 0x15a   : > { %p1122_p11 = pneg %p1121_p10 }
 0x15c   : > { %1209 = dma.done.wait (%p1122_p11), %s846_s22, 896  }
 0x15d   : > { %1211 = vsyncadd (%p1122_p11), %s846_s22, 4294966400  ;;  %p14_p12 = scmp.ge.s32.totalorder %s1281_s21, 4   ;;  %s1621_s15 = smov %s1218_s16 }
 0x15e   : > { %s1622_s16 = smov %s1222_s17  ;;  %s1623_s17 = smov %s1293_s24 }
 0x15f   : > { %s1624_s18 = smov %s1281_s21  ;;  %16 = sbr.rel (!%p14_p12) target bundleno = 3 (0x3), region = 123 }
 0x164   :  { %852 = vsyncpa [#allocation4], 1 }
 0x165   :  { %854 = vsyncpa [#allocation4 + $0x1], 1 }

</bundles_post_ra>
